<compile_context>
chip_gen: v5e
topology: v5e:2x2
jax: 0.10.0
libtpu: 0.0.40
codegen_flags: <defaults>
</compile_context>

<pallas_src>
import functools

import jax
import jax.numpy as jnp
from jax.experimental import pallas as pl
from jax.experimental.pallas import tpu as pltpu


def channel_gate_kernel(x_ref, w1_ref, b1_ref, w2_ref, b2_ref,
                        scale_ref, h_acc, *, inv_hw, bt):
    """One (bt, tc, HW) tile of x per step; c (grid axis 1) is the reduction axis.

    h_acc is a (2*bt, Ch) f32 scratch holding the pre-activation of the first MLP
    layer for the avg-pool path (rows [0, bt)) and the max-pool path (rows
    [bt, 2*bt)), accumulated over channel tiles.
    """
    c = pl.program_id(1)

    # Upcast for accumulation (no-op for f32 input; halves DMA bytes for bf16 x).
    x = x_ref[...].astype(jnp.float32)                     # (bt, tc, HW)
    # HW is fully resident, so these per-channel pools are final for this tile.
    tile_avg = jnp.sum(x, axis=-1) * inv_hw                # (bt, tc)
    tile_max = jnp.max(x, axis=-1)                         # (bt, tc)

    # Single MXU op for both pooling paths: (2bt, tc) @ (tc, Ch).
    stacked = jnp.concatenate([tile_avg, tile_max], axis=0)
    partial = jnp.dot(stacked, w1_ref[...], preferred_element_type=jnp.float32)

    @pl.when(c == 0)
    def _init():
        h_acc[...] = partial

    @pl.when(c > 0)
    def _accumulate():
        h_acc[...] = h_acc[...] + partial

    @pl.when(c == pl.num_programs(1) - 1)
    def _finalize():
        b1 = b1_ref[...]                                   # (1, Ch)
        h_avg = h_acc[pl.ds(0, bt), :]
        h_max = h_acc[pl.ds(bt, bt), :]
        # Shared second (linear) layer:
        #   mlp(avg) + mlp(max) == (relu(avg@W1+b1) + relu(max@W1+b1)) @ W2 + 2*b2
        h = jnp.maximum(h_avg + b1, 0.0) + jnp.maximum(h_max + b1, 0.0)
        att = (jnp.dot(h, w2_ref[...], preferred_element_type=jnp.float32)
               + 2.0 * b2_ref[...])                        # (bt, C)
        scale_ref[...] = jax.nn.sigmoid(att).astype(scale_ref.dtype)


def _tpu_budgets():
    """(per-x-block byte budget, vmem_limit_bytes), chosen per TPU generation."""
    try:
        phys_vmem = int(pltpu.get_tpu_info().vmem_capacity_bytes)
    except Exception:
        phys_vmem = 64 << 20                     # be conservative (v7x-sized)
    if phys_vmem >= (100 << 20):                 # v5e / v6e: 128 MiB physical VMEM
        # 2 x 12 MiB double-buffered x + tiny weights/scratch fits comfortably in a
        # raised 64 MiB scoped limit (also covers v5e's small 16 MiB default).
        return 12 << 20, 64 << 20
    # v7x-class (64 MiB physical): stay under the 32 MiB scoped default.
    return 8 << 20, 32 << 20


def _pick_block_b(B):
    # Output block is (bt, C): bt must be a multiple of 8 or equal B.
    # Prefer bt=8 when it gives >= 2 batch steps (megacore occupancy on v7x).
    if B <= 8:
        return B
    return 8 if B % 8 == 0 else B


def _pick_block_c(C, bt, HW, itemsize, block_budget):
    # x block is (bt, tc, HW); tc must be a multiple of 8 dividing C, or C itself.
    def fits(t):
        return bt * t * HW * itemsize <= block_budget

    if fits(C):
        return C
    cands = [t for t in range(8, C, 8) if C % t == 0]
    fitting = [t for t in cands if fits(t)]
    if fitting:
        return max(fitting)
    return min(cands) if cands else C


def channel_gate_scale(x, w1, b1, w2, b2, *, block_b=None, block_c=None,
                       buffer_count=2, vmem_limit_bytes=None):
    """Per-channel attention scale for ChannelGate: (B, C, H, W) -> (B, C) float32."""
    B, C, H, W = x.shape
    HW = H * W
    Ch = w1.shape[1]
    x_flat = x.reshape(B, C, HW)

    block_budget, default_vmem_limit = _tpu_budgets()
    if vmem_limit_bytes is None:
        vmem_limit_bytes = default_vmem_limit

    bt = block_b if block_b is not None else _pick_block_b(B)
    assert B % bt == 0, "block_b must divide B"
    tc = block_c if block_c is not None else _pick_block_c(
        C, bt, HW, jnp.dtype(x.dtype).itemsize, block_budget)
    assert C % tc == 0, "block_c must divide C"
    assert tc == C or tc % 8 == 0, "block_c must be a multiple of 8 (or equal C)"

    kernel = functools.partial(channel_gate_kernel, inv_hw=float(1.0 / HW), bt=bt)

    x_spec_kwargs = {}
    if buffer_count != 2:
        # Optional deeper pipelining for long channel loops (perf-review item);
        # keep the default 2 on v7x unless VMEM headroom allows more.
        x_spec_kwargs["pipeline_mode"] = pl.Buffered(buffer_count)

    scale = pl.pallas_call(
        kernel,
        out_shape=jax.ShapeDtypeStruct((B, C), jnp.float32),
        grid_spec=pltpu.PrefetchScalarGridSpec(
            num_scalar_prefetch=0,
            grid=(B // bt, C // tc),
            in_specs=[
                # x: full HW as the last dim (no 128-divisibility constraint on HW).
                pl.BlockSpec((bt, tc, HW), lambda b, c: (b, c, 0), **x_spec_kwargs),
                # W1 sliced along its input-channel rows to match the x tile.
                pl.BlockSpec((tc, Ch), lambda b, c: (c, 0)),
                pl.BlockSpec((1, Ch), lambda b, c: (0, 0)),
                pl.BlockSpec((Ch, C), lambda b, c: (0, 0)),
                pl.BlockSpec((1, C), lambda b, c: (0, 0)),
            ],
            out_specs=pl.BlockSpec((bt, C), lambda b, c: (b, 0)),
            scratch_shapes=[pltpu.VMEM((2 * bt, Ch), jnp.float32)],
        ),
        compiler_params=pltpu.CompilerParams(
            dimension_semantics=("parallel", "arbitrary"),
            vmem_limit_bytes=vmem_limit_bytes),
    )(x_flat, w1, b1, w2, b2)
    return scale


def channel_gate(x, w1, b1, w2, b2, **kwargs):
    """ChannelGate.forward semantics: sigmoid(att) expanded to x.shape."""
    scale = channel_gate_scale(x, w1, b1, w2, b2, **kwargs)
    return jnp.broadcast_to(scale[:, :, None, None].astype(x.dtype), x.shape)


def channel_gate_apply(x, w1, b1, w2, b2, **kwargs):
    """CGFE usage `feat * ChannelGate(feat)`; the multiply fuses into consumers via XLA."""
    scale = channel_gate_scale(x, w1, b1, w2, b2, **kwargs)
    return x * scale[:, :, None, None].astype(x.dtype)


def reference_channel_gate(x, w1, b1, w2, b2):
    xf = x.reshape(x.shape[0], x.shape[1], -1)
    avg = xf.mean(axis=-1)
    mx = xf.max(axis=-1)

    def mlp(p):
        h = jnp.maximum(p @ w1 + b1, 0.0)
        return h @ w2 + b2

    att = mlp(avg) + mlp(mx)
    scale = jax.nn.sigmoid(att)
    return jnp.broadcast_to(scale[:, :, None, None], x.shape)


if __name__ == "__main__":
    key = jax.random.PRNGKey(0)
    kx1, kx2, kx3, k1, k2, k3, k4 = jax.random.split(key, 7)

    C = 32
    reduction_ratio = 16
    Ch = C // reduction_ratio

    # nn.Linear(C, C//r) and nn.Linear(C//r, C) weights, stored as (in, out).
    w1 = jax.random.normal(k1, (C, Ch), dtype=jnp.float32) * (1.0 / jnp.sqrt(C))
    b1 = jax.random.normal(k2, (1, Ch), dtype=jnp.float32) * 0.01
    w2 = jax.random.normal(k3, (Ch, C), dtype=jnp.float32) * (1.0 / jnp.sqrt(Ch))
    b2 = jax.random.normal(k4, (1, C), dtype=jnp.float32) * 0.01

    # 1) Single-block case (whole C per step, HW a nice multiple of 128).
    x1 = jax.random.normal(kx1, (2, C, 16, 16), dtype=jnp.float32)
    out1 = jax.block_until_ready(channel_gate(x1, w1, b1, w2, b2))
    ref1 = reference_channel_gate(x1, w1, b1, w2, b2)
    assert out1.shape == x1.shape
    assert jnp.allclose(out1, ref1, atol=1e-5, rtol=1e-5), "case 1 mismatch"

    # 2) HW = 14*14 = 196 (NOT a multiple of 128) with channel tiling (tc=16):
    #    exercises the full-HW last dim and per-c-step W1 accumulation path.
    x2 = jax.random.normal(kx2, (2, C, 14, 14), dtype=jnp.float32)
    out2 = jax.block_until_ready(channel_gate(x2, w1, b1, w2, b2, block_c=16))
    ref2 = reference_channel_gate(x2, w1, b1, w2, b2)
    assert jnp.allclose(out2, ref2, atol=1e-5, rtol=1e-5), "case 2 mismatch"

    # 3) Larger batch (bt=8 -> two parallel batch steps) + fused application as
    #    CGFE consumes it: feat * ChannelGate(feat).
    x3 = jax.random.normal(kx3, (16, C, 12, 12), dtype=jnp.float32)
    gated = jax.block_until_ready(channel_gate_apply(x3, w1, b1, w2, b2))
    ref3 = x3 * reference_channel_gate(x3, w1, b1, w2, b2)
    assert jnp.allclose(gated, ref3, atol=1e-5, rtol=1e-5), "case 3 mismatch"

    print("KERNEL_OK")
</pallas_src>

<mosaic_0001>
module attributes {stable_mosaic.version = 11 : i64} {
  func.func @channel_gate_kernel(%arg0: i32, %arg1: i32, %arg2: memref<2x32x256xf32, #tpu.memory_space<vmem>>, %arg3: memref<32x2xf32, #tpu.memory_space<vmem>>, %arg4: memref<1x2xf32, #tpu.memory_space<vmem>>, %arg5: memref<2x32xf32, #tpu.memory_space<vmem>>, %arg6: memref<1x32xf32, #tpu.memory_space<vmem>>, %arg7: memref<2x32xf32, #tpu.memory_space<vmem>>, %arg8: memref<4x2xf32, #tpu.memory_space<vmem>>) attributes {dimension_semantics = [#tpu.dimension_semantics<parallel>, #tpu.dimension_semantics<arbitrary>], iteration_bounds = array<i64: 1, 1>, scalar_prefetch = 0 : i64, scratch_operands = 1 : i64, tpu.core_type = #tpu.core_type<tc>, window_params = [{transform_indices = @transform_0, window_bounds = array<i64: 2, 32, 256>}, {transform_indices = @transform_1, window_bounds = array<i64: 32, 2>}, {pipeline_mode = #tpu.pipeline_mode<synchronous>, transform_indices = @transform_2, window_bounds = array<i64: 1, 2>}, {pipeline_mode = #tpu.pipeline_mode<synchronous>, transform_indices = @transform_3, window_bounds = array<i64: 2, 32>}, {pipeline_mode = #tpu.pipeline_mode<synchronous>, transform_indices = @transform_4, window_bounds = array<i64: 1, 32>}, {transform_indices = @transform_5, window_bounds = array<i64: 2, 32>}]} {
    %c0 = arith.constant 0 : index
    %c0_0 = arith.constant 0 : index
    %c0_1 = arith.constant 0 : index
    %0 = vector.load %arg2[%c0, %c0_0, %c0_1] : memref<2x32x256xf32, #tpu.memory_space<vmem>>, vector<2x32x256xf32>
    %cst = arith.constant dense<0.000000e+00> : vector<2x32xf32>
    %1 = vector.multi_reduction <add>, %0, %cst [2] : vector<2x32x256xf32> to vector<2x32xf32>
    %cst_2 = arith.constant 3.906250e-03 : f32
    %2 = vector.broadcast %cst_2 : f32 to vector<2x32xf32>
    %3 = arith.mulf %1, %2 : vector<2x32xf32>
    %cst_3 = arith.constant dense<0xFF800000> : vector<2x32xf32>
    %4 = vector.multi_reduction <maximumf>, %0, %cst_3 [2] : vector<2x32x256xf32> to vector<2x32xf32>
    %5 = tpu.concatenate %3, %4 in 0 : vector<2x32xf32>, vector<2x32xf32> -> vector<4x32xf32>
    %c0_4 = arith.constant 0 : index
    %c0_5 = arith.constant 0 : index
    %6 = vector.load %arg3[%c0_4, %c0_5] : memref<32x2xf32, #tpu.memory_space<vmem>>, vector<32x2xf32>
    %cst_6 = arith.constant dense<0.000000e+00> : vector<4x2xf32>
    %7 = tpu.matmul %5, %6, %cst_6 {dimension_numbers = #tpu.dot_dimension_numbers<[1], [0], [0], [1], [0, 0, 1, 1], [], []>} : vector<4x32xf32>, vector<32x2xf32>, vector<4x2xf32> -> vector<4x2xf32>
    %c0_i32 = arith.constant 0 : i32
    %8 = arith.cmpi eq, %arg1, %c0_i32 : i32
    %9 = arith.extui %8 : i1 to i32
    %c0_i32_7 = arith.constant 0 : i32
    %10 = arith.cmpi ne, %9, %c0_i32_7 : i32
    scf.if %10 {
      %c0_12 = arith.constant 0 : index
      %c0_13 = arith.constant 0 : index
      %17 = vector.load %arg8[%c0_12, %c0_13] : memref<4x2xf32, #tpu.memory_space<vmem>>, vector<4x2xf32>
      tpu.vector_store %arg8[%c0_12, %c0_13], %7 {strides = array<i32>} : memref<4x2xf32, #tpu.memory_space<vmem>>, vector<4x2xf32>,
    } else {
    }
    %c0_i32_8 = arith.constant 0 : i32
    %11 = arith.cmpi sgt, %arg1, %c0_i32_8 : i32
    %12 = arith.extui %11 : i1 to i32
    %c0_i32_9 = arith.constant 0 : i32
    %13 = arith.cmpi ne, %12, %c0_i32_9 : i32
    scf.if %13 {
      %c0_12 = arith.constant 0 : index
      %c0_13 = arith.constant 0 : index
      %17 = vector.load %arg8[%c0_12, %c0_13] : memref<4x2xf32, #tpu.memory_space<vmem>>, vector<4x2xf32>
      %18 = arith.addf %17, %7 : vector<4x2xf32>
      %c0_14 = arith.constant 0 : index
      %c0_15 = arith.constant 0 : index
      %19 = vector.load %arg8[%c0_14, %c0_15] : memref<4x2xf32, #tpu.memory_space<vmem>>, vector<4x2xf32>
      tpu.vector_store %arg8[%c0_14, %c0_15], %18 {strides = array<i32>} : memref<4x2xf32, #tpu.memory_space<vmem>>, vector<4x2xf32>,
    } else {
    }
    %c0_i32_10 = arith.constant 0 : i32
    %14 = arith.cmpi eq, %arg1, %c0_i32_10 : i32
    %15 = arith.extui %14 : i1 to i32
    %c0_i32_11 = arith.constant 0 : i32
    %16 = arith.cmpi ne, %15, %c0_i32_11 : i32
    scf.if %16 {
      %c0_12 = arith.constant 0 : index
      %c0_13 = arith.constant 0 : index
      %17 = vector.load %arg4[%c0_12, %c0_13] : memref<1x2xf32, #tpu.memory_space<vmem>>, vector<1x2xf32>
      %c0_14 = arith.constant 0 : index
      %c0_15 = arith.constant 0 : index
      %18 = vector.load %arg8[%c0_14, %c0_15] : memref<4x2xf32, #tpu.memory_space<vmem>>, vector<2x2xf32>
      %c2 = arith.constant 2 : index
      %c0_16 = arith.constant 0 : index
      %19 = vector.load %arg8[%c2, %c0_16] : memref<4x2xf32, #tpu.memory_space<vmem>>, vector<2x2xf32>
      %20 = vector.broadcast %17 : vector<1x2xf32> to vector<2x2xf32>
      %21 = arith.addf %18, %20 : vector<2x2xf32>
      %cst_17 = arith.constant 0.000000e+00 : f32
      %22 = vector.broadcast %cst_17 : f32 to vector<2x2xf32>
      %23 = arith.maximumf %21, %22 : vector<2x2xf32>
      %24 = vector.broadcast %17 : vector<1x2xf32> to vector<2x2xf32>
      %25 = arith.addf %19, %24 : vector<2x2xf32>
      %cst_18 = arith.constant 0.000000e+00 : f32
      %26 = vector.broadcast %cst_18 : f32 to vector<2x2xf32>
      %27 = arith.maximumf %25, %26 : vector<2x2xf32>
      %28 = arith.addf %23, %27 : vector<2x2xf32>
      %c0_19 = arith.constant 0 : index
      %c0_20 = arith.constant 0 : index
      %29 = vector.load %arg5[%c0_19, %c0_20] : memref<2x32xf32, #tpu.memory_space<vmem>>, vector<2x32xf32>
      %cst_21 = arith.constant dense<0.000000e+00> : vector<2x32xf32>
      %30 = tpu.matmul %28, %29, %cst_21 {dimension_numbers = #tpu.dot_dimension_numbers<[1], [0], [0], [1], [0, 0, 1, 1], [], []>} : vector<2x2xf32>, vector<2x32xf32>, vector<2x32xf32> -> vector<2x32xf32>
      %c0_22 = arith.constant 0 : index
      %c0_23 = arith.constant 0 : index
      %31 = vector.load %arg6[%c0_22, %c0_23] : memref<1x32xf32, #tpu.memory_space<vmem>>, vector<1x32xf32>
      %cst_24 = arith.constant 2.000000e+00 : f32
      %32 = vector.broadcast %cst_24 : f32 to vector<1x32xf32>
      %33 = arith.mulf %32, %31 : vector<1x32xf32>
      %34 = vector.broadcast %33 : vector<1x32xf32> to vector<2x32xf32>
      %35 = arith.addf %30, %34 : vector<2x32xf32>
      %36 = arith.negf %35 : vector<2x32xf32>
      %37 = math.exp %36 : vector<2x32xf32>
      %cst_25 = arith.constant 1.000000e+00 : f32
      %38 = vector.broadcast %cst_25 : f32 to vector<2x32xf32>
      %39 = arith.addf %38, %37 : vector<2x32xf32>
      %40 = arith.divf %38, %39 : vector<2x32xf32>
      %c0_26 = arith.constant 0 : index
      %c0_27 = arith.constant 0 : index
      %41 = vector.load %arg7[%c0_26, %c0_27] : memref<2x32xf32, #tpu.memory_space<vmem>>, vector<2x32xf32>
      tpu.vector_store %arg7[%c0_26, %c0_27], %40 {strides = array<i32>} : memref<2x32xf32, #tpu.memory_space<vmem>>, vector<2x32xf32>,
    } else {
    }
    return
  }
  func.func @transform_0(%arg0: i32, %arg1: i32) -> (i32, i32, i32) {
    %c0_i32 = arith.constant 0 : i32
    %c0_i32_0 = arith.constant 0 : i32
    return %arg0, %arg1, %c0_i32 : i32, i32, i32
  }
  func.func @transform_1(%arg0: i32, %arg1: i32) -> (i32, i32) {
    %c0_i32 = arith.constant 0 : i32
    %c0_i32_0 = arith.constant 0 : i32
    return %arg1, %c0_i32 : i32, i32
  }
  func.func @transform_2(%arg0: i32, %arg1: i32) -> (i32, i32) {
    %c0_i32 = arith.constant 0 : i32
    %c0_i32_0 = arith.constant 0 : i32
    %c0_i32_1 = arith.constant 0 : i32
    return %c0_i32, %c0_i32_0 : i32, i32
  }
  func.func @transform_3(%arg0: i32, %arg1: i32) -> (i32, i32) {
    %c0_i32 = arith.constant 0 : i32
    %c0_i32_0 = arith.constant 0 : i32
    %c0_i32_1 = arith.constant 0 : i32
    return %c0_i32, %c0_i32_0 : i32, i32
  }
  func.func @transform_4(%arg0: i32, %arg1: i32) -> (i32, i32) {
    %c0_i32 = arith.constant 0 : i32
    %c0_i32_0 = arith.constant 0 : i32
    %c0_i32_1 = arith.constant 0 : i32
    return %c0_i32, %c0_i32_0 : i32, i32
  }
  func.func @transform_5(%arg0: i32, %arg1: i32) -> (i32, i32) {
    %c0_i32 = arith.constant 0 : i32
    %c0_i32_0 = arith.constant 0 : i32
    return %arg0, %c0_i32 : i32, i32
  }
}

</mosaic_0001>

<bundles_post_ra>
// kernel: tpu_custom_call.1
= control target key start
LH: loop header
LB: loop body
LE: loop exit
PB: predicated region body
PF: predicated region fallthrough
CT: control target
= control target key end

     0   :  { %10 = vsyncpa [#allocation4], 0  ;;  %s434_s0 = inlined_call_operand.hbm [shape: f32[2,32,256], index: 0, kind: input, shape index: {}]   ;;  %s435_s1 = inlined_call_operand.vmem [shape: f32[32,2], index: 1, kind: input, shape index: {}]   ;;  %s436_s2 = inlined_call_operand.vmem [shape: f32[1,2], index: 2, kind: input, shape index: {}]   ;;  %s437_s3 = inlined_call_operand.vmem [shape: f32[2,32], index: 3, kind: input, shape index: {}]   ;;  %s438_s4 = inlined_call_operand.vmem [shape: f32[1,32], index: 4, kind: input, shape index: {}]   ;;  %s439_s5 = inlined_call_operand.hbm [shape: f32[2,32], index: 5, kind: output, shape index: {}]  }
   0x1   :  { %11 = vsyncpa [#allocation5], 0  ;;  %s16_s20 = sshll.u32 %s434_s0, 4  ;;  %s361_s21 = smov [#allocation3]   ;;  %s17_s20 = int_to_ptr.hbm [resolvable:$true] %s16_s20 }
   0x2   :  { %s18_s22 = sshll.u32 %s361_s21, 4  ;;  %s362_s23 = smov 256   ;;  %s19_s22 = int_to_ptr.vmem [resolvable:$true] %s18_s22 }
   0x3   :  { %s363_s24 = smov 16  }
   0x4   :  { %24 = dma.hbm_to_vmem [thread:$0]  %s17_s20, 2048, %s19_s22, [#allocation4], %s362_s23, %s362_s23, %s363_s24  }
   0x5   :  { %357 = dma.done.wait [#allocation4], 2048  }
   0x6   :  { %358 = vsyncadd [#allocation4], 4294965248  ;;  %v45_v0 = vld [vmem:[#allocation3 + $0x40] sm:$0xff]  ;;  %v46_v1 = vld [vmem:[#allocation3 + $0x48] sm:$0xff]  ;;  %v117_v45 = vlaneseq  ;;  %vm122_vm0 = vcmask 130112   ;;  %vm126_vm1 = vcmask 195712  }
   0x7   :  { %v37_v2 = vld [vmem:[#allocation3] sm:$0xff]  ;;  %v65_v3 = vadd.f32 %v46_v1, %v45_v0  ;;  %v38_v4 = vld [vmem:[#allocation3 + $0x8] sm:$0xff]  ;;  %v47_v9 = vld [vmem:[#allocation3 + $0x50] sm:$0xff]  ;;  %v97_v25 = vmax.f32 %v45_v0, %v46_v1  ;;  %vm130_vm2 = vcmask 261312   ;;  %vm139_vm3 = vcmask 1041409   ;;  %s286_s13 = sshll.u32 %s439_s5, 4  ;;  %s287_s13 = int_to_ptr.hbm [resolvable:$true] %s286_s13 }
   0x8   :  { %v41_v5 = vld [vmem:[#allocation3 + $0x20] sm:$0xff]  ;;  %v42_v6 = vld [vmem:[#allocation3 + $0x28] sm:$0xff]  ;;  %v53_v7 = vadd.f32 %v38_v4, %v37_v2  ;;  %v48_v10 = vld [vmem:[#allocation3 + $0x58] sm:$0xff]  ;;  %v85_v24 = vmax.f32 %v37_v2, %v38_v4  ;;  %v118_v49 = vand.u32 127, %v117_v45  ;;  %vm164_vm4 = vcmask 1043459  }
   0x9   :  { %v59_v8 = vadd.f32 %v42_v6, %v41_v5  ;;  %66 = vadd.xlane.f32.xlu1 %v65_v3  ;;  %v39_v11 = vld [vmem:[#allocation3 + $0x10] sm:$0xff]  ;;  %v40_v12 = vld [vmem:[#allocation3 + $0x18] sm:$0xff]  ;;  %v49_v13 = vld [vmem:[#allocation3 + $0x60] sm:$0xff]  ;;  %v68_v15 = vadd.f32 %v48_v10, %v47_v9  ;;  %v100_v27 = vmax.f32 %v47_v9, %v48_v10  ;;  %v91_v29 = vmax.f32 %v41_v5, %v42_v6 }
   0xa   :  { %54 = vadd.xlane.f32.xlu0 %v53_v7  ;;  %v50_v14 = vld [vmem:[#allocation3 + $0x68] sm:$0xff]  ;;  %v56_v16 = vadd.f32 %v40_v12, %v39_v11  ;;  %v51_v18 = vld [vmem:[#allocation3 + $0x70] sm:$0xff]  ;;  %v52_v19 = vld [vmem:[#allocation3 + $0x78] sm:$0xff]  ;;  %v88_v26 = vmax.f32 %v39_v11, %v40_v12  ;;  %v120_v51 = vadd.s32 4294967288, %v118_v49  ;;  %v124_v55 = vadd.s32 4294967280, %v118_v49 }
   0xb   :  { %60 = vadd.xlane.f32.xlu2 %v59_v8  ;;  %v71_v17 = vadd.f32 %v50_v14, %v49_v13  ;;  %v43_v20 = vld [vmem:[#allocation3 + $0x30] sm:$0xff]  ;;  %v44_v21 = vld [vmem:[#allocation3 + $0x38] sm:$0xff]  ;;  %v74_v22 = vadd.f32 %v52_v19, %v51_v18  ;;  %v103_v28 = vmax.f32 %v49_v13, %v50_v14  ;;  %v106_v31 = vmax.f32 %v51_v18, %v52_v19  ;;  %v170_v40 = vld [vmem:[%s435_s1 + $0x8] sm:$0xff] }
   0xc   :  { %v62_v23 = vadd.f32 %v44_v21, %v43_v20  ;;  %v94_v30 = vmax.f32 %v43_v20, %v44_v21  ;;  %v172_v35 = vld [vmem:[%s435_s1 + $0x18] sm:$0xff]  ;;  %v171_v39 = vld [vmem:[%s435_s1 + $0x10] sm:$0xff]  ;;  %v169_v41 = vld [vmem:[%s435_s1] sm:$0xff]  ;;  %v128_v59 = vadd.s32 4294967272, %v118_v49  ;;  %vm167_vm5 = vcmask 1041408  }
   0xd   :  { %189 = vmatpush.msra.mxu0 %v172_v35  ;;  %vm173_vm6 = vcmask 261120   ;;  %vm201_vm7 = vcmask 11264   ;;  %vm231_vm8 = vcmask 15360   ;;  %vm277_vm12 = vcmask 254976  }
   0xf   :  { %190 = vmatpush.msra.mxu0 %v171_v39 }
  0x11   :  { %69 = vadd.xlane.f32.xlu1 %v68_v15  ;;  %191 = vmatpush.msra.mxu0 %v170_v40 }
  0x12   :  { %57 = vadd.xlane.f32.xlu0 %v56_v16 }
  0x13   :  { %72 = vadd.xlane.f32.xlu2 %v71_v17  ;;  %192 = vmatpush.msra.mxu0 %v169_v41 }
  0x19   :  { %75 = vadd.xlane.f32.xlu1 %v74_v22 }
  0x1a   :  { %63 = vadd.xlane.f32.xlu0 %v62_v23 }
  0x1b   :  { %86 = vmax.xlane.f32.xlu2 %v85_v24 }
  0x21   :  { %98 = vmax.xlane.f32.xlu1 %v97_v25 }
  0x22   :  { %89 = vmax.xlane.f32.xlu0 %v88_v26 }
  0x23   :  { %101 = vmax.xlane.f32.xlu2 %v100_v27 }
  0x29   :  { %104 = vmax.xlane.f32.xlu1 %v103_v28 }
  0x2a   :  { %92 = vmax.xlane.f32.xlu0 %v91_v29 }
  0x2b   :  { %95 = vmax.xlane.f32.xlu2 %v94_v30 }
  0x32   :  { %107 = vmax.xlane.f32.xlu0 %v106_v31 }
  0x7c   :  { %v67_v32 = vpop.xlane.xlu1 %66 }
  0x7d   :  { %v55_v33 = vpop.xlane.xlu0 %54  ;;  %v81_v50 = vmul.f32 0.00390625, %v67_v32  ;;  %v225_v32 = vld [vmem:[%s437_s3] sm:$0x3] }
  0x7e   :  { %v61_v34 = vpop.xlane.xlu2 %60  ;;  %v77_v54 = vmul.f32 0.00390625, %v55_v33  ;;  %297 = vmatpush.msk.msra.mxu1 %vm167_vm5, %v225_v32 }
  0x7f   :  { %v132_v56 = vperm.slane %v81_v50, %v118_v49  ;;  %v79_v57 = vmul.f32 0.00390625, %v61_v34  ;;  %v304_v34 = vld [vmem:[%s436_s2] ss:$0 sm:$0xff]  ;;  %s364_s2 = smov [#allocation6]  }
  0x80   :  { %v119_v1 = vperm.slane %v77_v54, %v118_v49  ;;  %s284_s3 = sshll.u32 %s364_s2, 4  ;;  %s285_s3 = int_to_ptr.vmem [resolvable:$true] %s284_s3 }
  0x81   :  { %v125_v7 = vperm.slane %v79_v57, %v124_v55 }
  0x84   :  { %v70_v36 = vpop.xlane.xlu1 %69 }
  0x85   :  { %v58_v37 = vpop.xlane.xlu0 %57  ;;  %v82_v52 = vmul.f32 0.00390625, %v70_v36 }
  0x86   :  { %v73_v38 = vpop.xlane.xlu2 %72  ;;  %v78_v53 = vmul.f32 0.00390625, %v58_v37 }
  0x87   :  { %v83_v58 = vmul.f32 0.00390625, %v73_v38  ;;  %v133_v61 = vperm.slane %v82_v52, %v120_v51 }
  0x88   :  { %v121_v62 = vperm.slane %v78_v53, %v120_v51 }
  0x89   :  { %v135_v8 = vperm.slane %v83_v58, %v124_v55  ;;  %v134_v11 = vsel %vm122_vm0, %v133_v61, %v132_v56 }
  0x8a   :  { %v123_v12 = vsel %vm122_vm0, %v121_v62, %v119_v1 }
  0x8b   :  { %v136_v19 = vsel %vm126_vm1, %v135_v8, %v134_v11  ;;  %v127_v22 = vsel %vm126_vm1, %v125_v7, %v123_v12 }
  0x8c   :  { %v76_v42 = vpop.xlane.xlu1 %75 }
  0x8d   :  { %v64_v43 = vpop.xlane.xlu0 %63  ;;  %v84_v63 = vmul.f32 0.00390625, %v76_v42  ;;  %v226_v42 = vld [vmem:[%s438_s4] sm:$0x1] }
  0x8e   :  { %v87_v44 = vpop.xlane.xlu2 %86  ;;  %v80_v0 = vmul.f32 0.00390625, %v64_v43  ;;  %v227_v43 = vmul.f32 2.0, %v226_v42 }
  0x8f   :  { %v150_v2 = vperm.slane %v87_v44, %v118_v49  ;;  %v137_v13 = vperm.slane %v84_v63, %v128_v59 }
  0x90   :  { %v129_v14 = vperm.slane %v80_v0, %v128_v59  ;;  %v229_v44 = vperm.slane %v227_v43, 0 }
  0x91   :  { %v138_v25 = vsel %vm130_vm2, %v137_v13, %v136_v19 }
  0x92   :  { %v131_v24 = vsel %vm130_vm2, %v129_v14, %v127_v22 }
  0x93   :  { %v140_v29 = vsel %vm139_vm3, %v138_v25, %v131_v24 }
  0x94   :  { %v99_v47 = vpop.xlane.xlu1 %98 }
  0x95   :  { %v90_v46 = vpop.xlane.xlu0 %89  ;;  %v157_v3 = vperm.slane %v99_v47, %v118_v49 }
  0x96   :  { %v102_v48 = vpop.xlane.xlu2 %101  ;;  %v151_v4 = vperm.slane %v90_v46, %v120_v51 }
  0x97   :  { %v158_v5 = vperm.slane %v102_v48, %v120_v51 }
  0x98   :  { %v152_v16 = vsel %vm122_vm0, %v151_v4, %v150_v2 }
  0x99   :  { %v159_v17 = vsel %vm122_vm0, %v158_v5, %v157_v3 }
  0x9c   :  { %v105_v6 = vpop.xlane.xlu1 %104 }
  0x9d   :  { %v93_v60 = vpop.xlane.xlu0 %92  ;;  %v160_v15 = vperm.slane %v105_v6, %v124_v55 }
  0x9e   :  { %v153_v9 = vperm.slane %v93_v60, %v124_v55  ;;  %v96_v10 = vpop.xlane.xlu2 %95 }
  0x9f   :  { %v155_v18 = vperm.slane %v96_v10, %v128_v59  ;;  %v161_v26 = vsel %vm126_vm1, %v160_v15, %v159_v17 }
  0xa0   :  { %v154_v20 = vsel %vm126_vm1, %v153_v9, %v152_v16 }
  0xa1   :  { %v156_v27 = vsel %vm130_vm2, %v155_v18, %v154_v20 }
  0xa5   :  { %v108_v21 = vpop.xlane.xlu0 %107 }
  0xa6   :  { %v162_v23 = vperm.slane %v108_v21, %v128_v59 }
  0xa8   :  { %v163_v28 = vsel %vm130_vm2, %v162_v23, %v161_v26 }
  0xa9   :  { %v165_v30 = vsel %vm164_vm4, %v163_v28, %v156_v27 }
  0xaa   :  { %v168_v31 = vsel %vm167_vm5, %v140_v29, %v165_v30 }
  0xab   :  { %296 = vmatmul.msk.f32.vlgmr.msra.gmra.mxu0 %vm173_vm6, %v168_v31 }
 0x128   :  { %v194_v33 = vpop.f32.mrf.mxu0 }
 0x129   :  { %202 = vst.msk [vmem:[#allocation2] sm:$0xf] %vm201_vm7, %v194_v33 }
 0x130   :  { %v215_v35 = vld [vmem:[#allocation2] sm:$0x3]  ;;  %v216_v36 = vld [vmem:[#allocation2 + $0x2] sm:$0x3] }
 0x131   :  { %v220_v37 = vadd.f32 %v304_v34, %v215_v35  ;;  %v222_v38 = vadd.f32 %v304_v34, %v216_v36 }
 0x133   :  { %v221_v39 = vmax.f32 %v220_v37, 0.0  ;;  %v223_v40 = vmax.f32 %v222_v38, 0.0 }
 0x135   :  { %v224_v41 = vadd.f32 %v223_v40, %v221_v39 }
 0x137   :  { %298 = vmatmul.msk.f32.vlgmr.msra.gmra.mxu1 %vm231_vm8, %v224_v41 }
 0x1b4   :  { %v255_v45 = vpop.f32.mrf.mxu1 }
 0x1b5   :  { %v256_v46 = vadd.f32 %v255_v45, %v229_v44 }
 0x1b7   :  { %v299_v47 = vmul.f32 -1.442695, %v256_v46 }
 0x1b9   :  { %305 = vpow2.f32 %v299_v47 }
 0x1bf   :  { %v306_v48 = vpop.eup %305 }
 0x1c0   :  { %v261_v49 = vadd.f32 1.0, %v306_v48 }
 0x1c2   :  { %307 = vrcp.f32 %v261_v49  ;;  %v273_v53 = vand.u32 2147483648, %v261_v49  ;;  %v271_v55 = vand.u32 2147483647, %v261_v49  ;;  %vm267_vm10 = vweird.f32 %v261_v49 }
 0x1c4   :  { %v274_v57 = vor.u32 1.1754944e-38, %v273_v53  ;;  %vm272_vm13 = vcmp.eq.f32.partialorder %v271_v55, 8.507059e+37 }
 0x1c8   :  { %v308_v50 = vpop.eup %307 }
 0x1c9   :  { %v263_v51 = vmul.f32 %v308_v50, %v261_v49  ;;  %vm268_vm9 = vweird.f32 %v308_v50 }
 0x1ca   :  { %vm269_vm11 = vmor %vm267_vm10, %vm268_vm9 }
 0x1cb   :  { %v264_v52 = vsub.f32 1.0, %v263_v51 }
 0x1cd   :  { %v265_v54 = vmul.f32 %v308_v50, %v264_v52 }
 0x1cf   :  { %v266_v56 = vadd.f32 %v308_v50, %v265_v54 }
 0x1d1   :  { %v270_v58 = vsel %vm269_vm11, %v308_v50, %v266_v56 }
 0x1d2   :  { %v275_v59 = vsel %vm272_vm13, %v274_v57, %v270_v58 }
 0x1d3   :  { %278 = vst.msk [vmem:[#allocation6] sm:$0x3] %vm277_vm12, %v275_v59 }
 0x1d4   :  { %289 = dma.vmem_to_hbm [thread:$0]  %s285_s3, 32, %s287_s13, [#allocation5]  }
 0x1d5   :  { %359 = dma.done.wait [#allocation5], 32  }
 0x1d6   :  { %360 = vsyncadd [#allocation5], 4294967264 }
 0x1d7   :  { %294 = vsyncpa [#allocation4], 1 }
 0x1d8   :  { %295 = vsyncpa [#allocation5], 1 }

</bundles_post_ra>
